<compile_context>
chip_gen: v7x
topology: tpu7x:2x2x1
jax: 0.10.0
libtpu: 0.0.40
codegen_flags: <defaults>
</compile_context>

<pallas_src>
import jax
import jax.numpy as jnp
from jax.experimental import pallas as pl
from jax.experimental.pallas import tpu as pltpu


def mlp_kernel(x_ref, w1_ref, b1_ref, w2_ref, b2_ref, w3_ref, b3_ref, o_ref):
    # Cast x to bf16 in-kernel (free on the VPU, hides under the input DMA).
    x = x_ref[...].astype(jnp.bfloat16)
    # Layer 1: Linear (bf16 operands, f32 accumulate) + bias + ReLU in f32.
    h1 = jnp.dot(x, w1_ref[...], preferred_element_type=jnp.float32)
    h1 = jnp.maximum(h1 + b1_ref[...], 0.0)
    # Layer 2: Linear + bias + ReLU.
    h2 = jnp.dot(h1.astype(jnp.bfloat16), w2_ref[...],
                 preferred_element_type=jnp.float32)
    h2 = jnp.maximum(h2 + b2_ref[...], 0.0)
    # Output layer: Linear (no activation); cast to bf16 only at the store.
    out = jnp.dot(h2.astype(jnp.bfloat16), w3_ref[...],
                  preferred_element_type=jnp.float32)
    o_ref[...] = (out + b3_ref[...]).astype(o_ref.dtype)


def _round_up(n, m):
    return ((n + m - 1) // m) * m


def mlp_forward(x, params, *, tb=2048, min_grid_steps=2):
    """x: [B, D_in] float32.  params: 3x (W [in,out] f32, b [1,out] f32).

    Returns [B, out_dim] bfloat16 (f32 accumulation inside the kernel).
    """
    w1, b1, w2, b2, w3, b3 = params
    B, d_in = x.shape
    out_dim = w3.shape[1]

    # Batch tile: multiple of 16 (bf16 sublane packing; also covers f32's 8),
    # capped at `tb`, and shrunk so the grid keeps >= min_grid_steps steps when
    # B allows it (lets v7x shard the batch across its 2 TensorCores).
    tb_eff = min(tb, _round_up(B, 16))
    if B >= 16 * min_grid_steps:
        tb_eff = min(tb_eff, _round_up(pl.cdiv(B, min_grid_steps), 16))

    grid = (pl.cdiv(B, tb_eff),)  # last block may be partial: no cross-row
                                  # reduction, OOB output rows are discarded.
    const = lambda i: (0, 0)      # weights/biases resident in VMEM across grid

    # Weights are tiny -> wrapper-side bf16 cast is negligible traffic.
    w1b = w1.astype(jnp.bfloat16)
    w2b = w2.astype(jnp.bfloat16)
    w3b = w3.astype(jnp.bfloat16)

    out = pl.pallas_call(
        mlp_kernel,
        out_shape=jax.ShapeDtypeStruct((B, out_dim), jnp.bfloat16),
        grid=grid,
        in_specs=[
            pl.BlockSpec((tb_eff, d_in), lambda i: (i, 0)),   # x tile (f32)
            pl.BlockSpec(w1b.shape, const),
            pl.BlockSpec(b1.shape, const),
            pl.BlockSpec(w2b.shape, const),
            pl.BlockSpec(b2.shape, const),
            pl.BlockSpec(w3b.shape, const),
            pl.BlockSpec(b3.shape, const),
        ],
        out_specs=pl.BlockSpec((tb_eff, out_dim), lambda i: (i, 0)),
        compiler_params=pltpu.CompilerParams(
            dimension_semantics=("parallel",)),
    )(x, w1b, b1, w2b, b2, w3b, b3)

    return out


def init_linear(key, fan_in, fan_out):
    """Deterministic init mimicking PyTorch nn.Linear (uniform +/- 1/sqrt(fan_in)).
    Returns W already transposed to [in, out] and bias as [1, out]."""
    kw, kb = jax.random.split(key)
    bound = 1.0 / jnp.sqrt(fan_in)
    w = jax.random.uniform(kw, (fan_in, fan_out), jnp.float32, -bound, bound)
    b = jax.random.uniform(kb, (1, fan_out), jnp.float32, -bound, bound)
    return w, b


if __name__ == "__main__":
    key = jax.random.PRNGKey(0)
    k_x, k1, k2, k3 = jax.random.split(key, 4)

    # Shapes implied by the module config above (small demo batch).
    B = 64
    layers = [32, 64, 32]
    output_size = 48  # max_iid + 1

    x = jax.random.normal(k_x, (B, layers[0]), jnp.float32)

    w1, b1 = init_linear(k1, layers[0], layers[1])
    w2, b2 = init_linear(k2, layers[1], layers[2])
    w3, b3 = init_linear(k3, layers[2], output_size)
    params = (w1, b1, w2, b2, w3, b3)

    out = mlp_forward(x, params)
    out = jax.block_until_ready(out)

    # Pure-f32 JAX reference of the forward semantics (dropout is identity at eval).
    ref = jnp.maximum(x @ w1 + b1, 0.0)
    ref = jnp.maximum(ref @ w2 + b2, 0.0)
    ref = ref @ w3 + b3

    assert out.shape == (B, output_size)
    assert out.dtype == jnp.bfloat16
    # bf16 matmul operands + bf16 output store, f32 accumulation -> relaxed tolerance.
    assert jnp.allclose(out.astype(jnp.float32), ref, atol=5e-2, rtol=5e-2)

    print("KERNEL_OK")
</pallas_src>

<mosaic_0001>
module attributes {stable_mosaic.version = 11 : i64} {
  func.func @mlp_kernel(%arg0: i32, %arg1: memref<32x32xf32, #tpu.memory_space<vmem>>, %arg2: memref<32x64xbf16, #tpu.memory_space<vmem>>, %arg3: memref<1x64xf32, #tpu.memory_space<vmem>>, %arg4: memref<64x32xbf16, #tpu.memory_space<vmem>>, %arg5: memref<1x32xf32, #tpu.memory_space<vmem>>, %arg6: memref<32x48xbf16, #tpu.memory_space<vmem>>, %arg7: memref<1x48xf32, #tpu.memory_space<vmem>>, %arg8: memref<32x48xbf16, #tpu.memory_space<vmem>>) attributes {dimension_semantics = [#tpu.dimension_semantics<parallel>], iteration_bounds = array<i64: 2>, scalar_prefetch = 0 : i64, scratch_operands = 0 : i64, tpu.core_type = #tpu.core_type<tc>, window_params = [{transform_indices = @transform_0, window_bounds = array<i64: 32, 32>}, {pipeline_mode = #tpu.pipeline_mode<synchronous>, transform_indices = @transform_1, window_bounds = array<i64: 32, 64>}, {pipeline_mode = #tpu.pipeline_mode<synchronous>, transform_indices = @transform_2, window_bounds = array<i64: 1, 64>}, {pipeline_mode = #tpu.pipeline_mode<synchronous>, transform_indices = @transform_3, window_bounds = array<i64: 64, 32>}, {pipeline_mode = #tpu.pipeline_mode<synchronous>, transform_indices = @transform_4, window_bounds = array<i64: 1, 32>}, {pipeline_mode = #tpu.pipeline_mode<synchronous>, transform_indices = @transform_5, window_bounds = array<i64: 32, 48>}, {pipeline_mode = #tpu.pipeline_mode<synchronous>, transform_indices = @transform_6, window_bounds = array<i64: 1, 48>}, {transform_indices = @transform_7, window_bounds = array<i64: 32, 48>}]} {
    %c0 = arith.constant 0 : index
    %c0_0 = arith.constant 0 : index
    %0 = vector.load %arg1[%c0, %c0_0] : memref<32x32xf32, #tpu.memory_space<vmem>>, vector<32x32xf32>
    %1 = arith.truncf %0 : vector<32x32xf32> to vector<32x32xbf16>
    %c0_1 = arith.constant 0 : index
    %c0_2 = arith.constant 0 : index
    %2 = vector.load %arg2[%c0_1, %c0_2] : memref<32x64xbf16, #tpu.memory_space<vmem>>, vector<32x64xbf16>
    %cst = arith.constant dense<0.000000e+00> : vector<32x64xf32>
    %3 = tpu.matmul %1, %2, %cst {dimension_numbers = #tpu.dot_dimension_numbers<[1], [0], [0], [1], [0, 0, 1, 1], [], []>} : vector<32x32xbf16>, vector<32x64xbf16>, vector<32x64xf32> -> vector<32x64xf32>
    %c0_3 = arith.constant 0 : index
    %c0_4 = arith.constant 0 : index
    %4 = vector.load %arg3[%c0_3, %c0_4] : memref<1x64xf32, #tpu.memory_space<vmem>>, vector<1x64xf32>
    %5 = vector.broadcast %4 : vector<1x64xf32> to vector<32x64xf32>
    %6 = arith.addf %3, %5 : vector<32x64xf32>
    %cst_5 = arith.constant 0.000000e+00 : f32
    %7 = vector.broadcast %cst_5 : f32 to vector<32x64xf32>
    %8 = arith.maximumf %6, %7 : vector<32x64xf32>
    %9 = arith.truncf %8 : vector<32x64xf32> to vector<32x64xbf16>
    %c0_6 = arith.constant 0 : index
    %c0_7 = arith.constant 0 : index
    %10 = vector.load %arg4[%c0_6, %c0_7] : memref<64x32xbf16, #tpu.memory_space<vmem>>, vector<64x32xbf16>
    %cst_8 = arith.constant dense<0.000000e+00> : vector<32x32xf32>
    %11 = tpu.matmul %9, %10, %cst_8 {dimension_numbers = #tpu.dot_dimension_numbers<[1], [0], [0], [1], [0, 0, 1, 1], [], []>} : vector<32x64xbf16>, vector<64x32xbf16>, vector<32x32xf32> -> vector<32x32xf32>
    %c0_9 = arith.constant 0 : index
    %c0_10 = arith.constant 0 : index
    %12 = vector.load %arg5[%c0_9, %c0_10] : memref<1x32xf32, #tpu.memory_space<vmem>>, vector<1x32xf32>
    %13 = vector.broadcast %12 : vector<1x32xf32> to vector<32x32xf32>
    %14 = arith.addf %11, %13 : vector<32x32xf32>
    %cst_11 = arith.constant 0.000000e+00 : f32
    %15 = vector.broadcast %cst_11 : f32 to vector<32x32xf32>
    %16 = arith.maximumf %14, %15 : vector<32x32xf32>
    %17 = arith.truncf %16 : vector<32x32xf32> to vector<32x32xbf16>
    %c0_12 = arith.constant 0 : index
    %c0_13 = arith.constant 0 : index
    %18 = vector.load %arg6[%c0_12, %c0_13] : memref<32x48xbf16, #tpu.memory_space<vmem>>, vector<32x48xbf16>
    %cst_14 = arith.constant dense<0.000000e+00> : vector<32x48xf32>
    %19 = tpu.matmul %17, %18, %cst_14 {dimension_numbers = #tpu.dot_dimension_numbers<[1], [0], [0], [1], [0, 0, 1, 1], [], []>} : vector<32x32xbf16>, vector<32x48xbf16>, vector<32x48xf32> -> vector<32x48xf32>
    %c0_15 = arith.constant 0 : index
    %c0_16 = arith.constant 0 : index
    %20 = vector.load %arg7[%c0_15, %c0_16] : memref<1x48xf32, #tpu.memory_space<vmem>>, vector<1x48xf32>
    %21 = vector.broadcast %20 : vector<1x48xf32> to vector<32x48xf32>
    %22 = arith.addf %19, %21 : vector<32x48xf32>
    %23 = arith.truncf %22 : vector<32x48xf32> to vector<32x48xbf16>
    %c0_17 = arith.constant 0 : index
    %c0_18 = arith.constant 0 : index
    %24 = vector.load %arg8[%c0_17, %c0_18] : memref<32x48xbf16, #tpu.memory_space<vmem>>, vector<32x48xbf16>
    tpu.vector_store %arg8[%c0_17, %c0_18], %23 {strides = array<i32>} : memref<32x48xbf16, #tpu.memory_space<vmem>>, vector<32x48xbf16>,
    return
  }
  func.func @transform_0(%arg0: i32) -> (i32, i32) {
    %c0_i32 = arith.constant 0 : i32
    %c0_i32_0 = arith.constant 0 : i32
    return %arg0, %c0_i32 : i32, i32
  }
  func.func @transform_1(%arg0: i32) -> (i32, i32) {
    %c0_i32 = arith.constant 0 : i32
    %c0_i32_0 = arith.constant 0 : i32
    %c0_i32_1 = arith.constant 0 : i32
    return %c0_i32, %c0_i32_0 : i32, i32
  }
  func.func @transform_2(%arg0: i32) -> (i32, i32) {
    %c0_i32 = arith.constant 0 : i32
    %c0_i32_0 = arith.constant 0 : i32
    %c0_i32_1 = arith.constant 0 : i32
    return %c0_i32, %c0_i32_0 : i32, i32
  }
  func.func @transform_3(%arg0: i32) -> (i32, i32) {
    %c0_i32 = arith.constant 0 : i32
    %c0_i32_0 = arith.constant 0 : i32
    %c0_i32_1 = arith.constant 0 : i32
    return %c0_i32, %c0_i32_0 : i32, i32
  }
  func.func @transform_4(%arg0: i32) -> (i32, i32) {
    %c0_i32 = arith.constant 0 : i32
    %c0_i32_0 = arith.constant 0 : i32
    %c0_i32_1 = arith.constant 0 : i32
    return %c0_i32, %c0_i32_0 : i32, i32
  }
  func.func @transform_5(%arg0: i32) -> (i32, i32) {
    %c0_i32 = arith.constant 0 : i32
    %c0_i32_0 = arith.constant 0 : i32
    %c0_i32_1 = arith.constant 0 : i32
    return %c0_i32, %c0_i32_0 : i32, i32
  }
  func.func @transform_6(%arg0: i32) -> (i32, i32) {
    %c0_i32 = arith.constant 0 : i32
    %c0_i32_0 = arith.constant 0 : i32
    %c0_i32_1 = arith.constant 0 : i32
    return %c0_i32, %c0_i32_0 : i32, i32
  }
  func.func @transform_7(%arg0: i32) -> (i32, i32) {
    %c0_i32 = arith.constant 0 : i32
    %c0_i32_0 = arith.constant 0 : i32
    return %arg0, %c0_i32 : i32, i32
  }
}

</mosaic_0001>

<bundles_post_ra>
// kernel: tpu_custom_call.1
= control target key start
LH: loop header
LB: loop body
LE: loop exit
PB: predicated region body
PF: predicated region fallthrough
CT: control target
= control target key end

     0   :  { %s772_s24 = smov 0   ;;  %s830_s0 = inlined_call_operand.vmem [shape: f32[64,32], index: 0, kind: input, shape index: {}]   ;;  %s831_s1 = inlined_call_operand.vmem [shape: bf16[32,64], index: 1, kind: input, shape index: {}]   ;;  %s832_s2 = inlined_call_operand.vmem [shape: f32[1,64], index: 2, kind: input, shape index: {}]   ;;  %s833_s3 = inlined_call_operand.vmem [shape: bf16[64,32], index: 3, kind: input, shape index: {}]   ;;  %s834_s4 = inlined_call_operand.vmem [shape: f32[1,32], index: 4, kind: input, shape index: {}]   ;;  %s835_s5 = inlined_call_operand.vmem [shape: bf16[32,48], index: 5, kind: input, shape index: {}]   ;;  %s836_s6 = inlined_call_operand.vmem [shape: f32[1,48], index: 6, kind: input, shape index: {}]   ;;  %s837_s7 = inlined_call_operand.vmem [shape: bf16[64,48], index: 7, kind: output, shape index: {}]  }
   0x1 LB: > { %s630_s25 = sadd.s32 4294967295, %s730_s24   ;;  %p634_p0 = scmp.ge.s32.totalorder %s730_s24, 1  ;;  %s730_s24 = sphi %s772_s24, %s17_s24  }
   0x2   : > { %p238_p1 = scmp.lt.s32.totalorder %s730_s24, 3 }
   0x4   : > { %p239_p2 = pnand %p634_p0, %p238_p1 }
   0x5   : > { %v716_v0 = vld [vmem:[%s831_s1] sm:$0xff] (!%p239_p2)   ;;  %s635_s28 = sshll.u32 (!%p239_p2), %s630_s25, 2  ;;  %v717_v1 = vld [vmem:[%s831_s1 + $0x8] sm:$0xff] (!%p239_p2)   ;;  %vm312_vm0 = vcmask (!%p239_p2), 261120   ;;  %v720_v10 = vld [vmem:[%s833_s3 + $0x10] sm:$0xff] (!%p239_p2)   ;;  %vm413_vm1 = vcmask (!%p239_p2), 523264  }
   0x6   : > { %242 = sbr.rel (%p239_p2) target bundleno = 684 (0x2ac), region = 48  ;;  %p271_p3 = scmp.lt.s32.totalorder (!%p239_p2), %s635_s28, 7  ;;  %680 = vmatprep.subr.bf16.mxu0 (!%p239_p2), %v716_v0  ;;  %v718_v2 = vld [vmem:[%s833_s3] sm:$0xff] (!%p239_p2)   ;;  %v719_v3 = vld [vmem:[%s833_s3 + $0x8] sm:$0xff] (!%p239_p2)   ;;  %v721_v11 = vld [vmem:[%s833_s3 + $0x18] sm:$0xff] (!%p239_p2)   ;;  %vm569_vm2 = vcmask (!%p239_p2), 388096  }
   0x7   : > { %681 = vmatpush3.bf16.msra.mxu0 (!%p239_p2), %v716_v0  ;;  %688 = vmatprep.subr.bf16.mxu1 (!%p239_p2), %v718_v2  ;;  %v639_v12 = vld [vmem:[%s832_s2] ss:$0 sm:$0xff] (!%p239_p2)  ;;  %v723_v28 = vld [vmem:[%s835_s5 + $0x8] sm:$0xff] (!%p239_p2)  }
   0x8   : > { %682 = vmatprep.subr.bf16.mxu0 (!%p239_p2), %v717_v1  ;;  %689 = vmatpush3.bf16.msra.mxu1 (!%p239_p2), %v718_v2  ;;  %v722_v27 = vld [vmem:[%s835_s5] sm:$0xff] (!%p239_p2)  }
   0x9   : > { %690 = vmatprep.subr.bf16.mxu1 (!%p239_p2), %v719_v3  ;;  %v644_v29 = vld [vmem:[%s834_s4] ss:$0 sm:$0xff] (!%p239_p2) }
   0xa   : > { %v651_v44 = vld [vmem:[%s836_s6] ss:$0 sm:$0xff] (!%p239_p2) }
   0xb   : > { %683 = vmatpush3.bf16.msra.mxu0 (!%p239_p2), %v717_v1 }
   0xc   : > { %691 = vmatpush3.bf16.msra.mxu1 (!%p239_p2), %v719_v3  ;;  %700 = vmatprep.subr.bf16.mxu0 (!%p239_p2), %v722_v27 }
   0xd   : > { %s839_s28 = smov (!%p271_p3, %s635_s28), 7  ;;  %692 = vmatprep.subr.bf16.mxu1 %v720_v10 }
   0xe   : > { %s636_s12 = sshll.u32 %s839_s28, 3  ;;  %s638_s9 = sshll.u32 %s839_s28, 2 }
   0xf   : > { %s274_s15 = scalar_lea.vmem %s830_s0, %s636_s12  ;;  %s280_s12 = scalar_lea.vmem %s837_s7, %s638_s9 }
  0x10   : > { %v283_v4 = vld [vmem:[%s274_s15] sm:$0xff]  ;;  %v284_v5 = vld [vmem:[%s274_s15 + $0x8] sm:$0xff]  ;;  %v285_v6 = vld [vmem:[%s274_s15 + $0x10] sm:$0xff]  ;;  %693 = vmatpush3.bf16.msra.mxu1 %v720_v10 }
  0x11   : > { %v287_v7 = vpack.c.bf16 %v284_v5, %v283_v4  ;;  %v286_v8 = vld [vmem:[%s274_s15 + $0x18] sm:$0xff]  ;;  %694 = vmatprep.subr.bf16.mxu1 %v721_v11 }
  0x12   : > { %v288_v9 = vpack.c.bf16 %v286_v8, %v285_v6 }
  0x13   : > { %684 = vmatprep.mubr.msk.bf16.mxu0 %vm312_vm0, %v287_v7 }
  0x14   : > { %685 = vmatmul.mubr.msk.bf16.vlgmr.msra.gmra.mrb[0].mxu0 %vm312_vm0, %v288_v9  ;;  %695 = vmatpush3.bf16.msra.mxu1 %v721_v11 }
  0x15   : > { %701 = vmatpush3.bf16.msra.mxu0 %v722_v27 }
  0x16   : > { %702 = vmatprep.subr.bf16.mxu0 %v723_v28 }
  0x19   : > { %703 = vmatpush3.bf16.msra.mxu0 %v723_v28 }
  0xe7   : > { %v686_v13 = vpop.f32.mrb[0].mxu0 }
  0xe8   : > { %v362_v14 = vadd.f32 %v686_v13, %v639_v12  ;;  %v353_v15 = vpop.f32.mrb[1].mxu0 }
  0xe9   : > { %v354_v16 = vadd.f32 %v639_v12, %v353_v15  ;;  %v687_v17 = vpop.f32.mrb[2].mxu0 }
  0xea   : > { %v365_v18 = vadd.f32 %v687_v17, %v639_v12  ;;  %v356_v19 = vpop.f32.mrb[3].mxu0  ;;  %v370_v21 = vmax.f32 %v362_v14, 0.0 }
  0xeb   : > { %v357_v20 = vadd.f32 %v639_v12, %v356_v19  ;;  %v368_v23 = vmax.f32 %v354_v16, 0.0 }
  0xec   : > { %v371_v22 = vmax.f32 %v365_v18, 0.0 }
  0xed   : > { %v369_v24 = vmax.f32 %v357_v20, 0.0 }
  0xee   : > { %v373_v25 = vpack.c.bf16 %v371_v22, %v370_v21 }
  0xef   : > { %v372_v26 = vpack.c.bf16 %v369_v24, %v368_v23 }
  0xf1   : > { %696 = vmatprep.mubr.msk.bf16.mxu1 %vm413_vm1, %v372_v26 }
  0xf2   : > { %697 = vmatmul.mubr.msk.bf16.vlgmr.msra.gmra.mrb[0].mxu1 %vm413_vm1, %v373_v25 }
 0x1c5   : > { %v698_v30 = vpop.f32.mrb[0].mxu1 }
 0x1c6   : > { %v463_v31 = vadd.f32 %v698_v30, %v644_v29  ;;  %v454_v32 = vpop.f32.mrb[1].mxu1 }
 0x1c7   : > { %v455_v33 = vadd.f32 %v644_v29, %v454_v32  ;;  %v699_v34 = vpop.f32.mrb[2].mxu1 }
 0x1c8   : > { %v466_v35 = vadd.f32 %v699_v34, %v644_v29  ;;  %v457_v36 = vpop.f32.mrb[3].mxu1  ;;  %v471_v38 = vmax.f32 %v463_v31, 0.0 }
 0x1c9   : > { %v458_v37 = vadd.f32 %v644_v29, %v457_v36  ;;  %v469_v40 = vmax.f32 %v455_v33, 0.0 }
 0x1ca   : > { %v472_v39 = vmax.f32 %v466_v35, 0.0 }
 0x1cb   : > { %v470_v41 = vmax.f32 %v458_v37, 0.0 }
 0x1cc   : > { %v474_v42 = vpack.c.bf16 %v472_v39, %v471_v38 }
 0x1cd   : > { %v473_v43 = vpack.c.bf16 %v470_v41, %v469_v40 }
 0x1cf   : > { %704 = vmatprep.mubr.msk.bf16.mxu0 %vm312_vm0, %v473_v43 }
 0x1d0   : > { %705 = vmatmul.mubr.msk.bf16.vlgmr.msra.gmra.mrb[4].mxu0 %vm312_vm0, %v474_v42 }
 0x2a3   : > { %v706_v45 = vpop.f32.mrb[4].mxu0 }
 0x2a4   : > { %v538_v46 = vpop.f32.mrb[5].mxu0  ;;  %v547_v49 = vadd.f32 %v706_v45, %v651_v44 }
 0x2a5   : > { %v539_v47 = vadd.f32 %v651_v44, %v538_v46  ;;  %v707_v48 = vpop.f32.mrb[6].mxu0 }
 0x2a6   : > { %v541_v50 = vpop.f32.mrb[7].mxu0  ;;  %v550_v52 = vadd.f32 %v707_v48, %v651_v44  ;;  %v664_v55 = vpack.c.bf16 %v547_v49, %v547_v49 }
 0x2a7   : > { %v662_v51 = vpack.c.bf16 %v539_v47, %v539_v47  ;;  %v542_v53 = vadd.f32 %v651_v44, %v541_v50 }
 0x2a8   : > { %v665_v56 = vpack.c.bf16 %v550_v52, %v550_v52  ;;  %572 = vst.msk [vmem:[%s280_s12 + $0x8] sm:$0xf] %vm569_vm2, %v664_v55 }
 0x2a9   : > { %570 = vst.msk [vmem:[%s280_s12] sm:$0xf] %vm569_vm2, %v662_v51  ;;  %v663_v54 = vpack.c.bf16 %v542_v53, %v542_v53 }
 0x2aa   : > { %573 = vst.msk [vmem:[%s280_s12 + $0xc] sm:$0xf] %vm569_vm2, %v665_v56 }
 0x2ab   : > { %571 = vst.msk [vmem:[%s280_s12 + $0x4] sm:$0xf] %vm569_vm2, %v663_v54 }
 0x2ac PF: > { %s17_s24 = sadd.s32 1, %s730_s24  }
 0x2ad   : > { %p14_p4 = scmp.ge.s32.totalorder %s17_s24, 4  }
 0x2af   :  { %16 = sbr.rel (!%p14_p4) target bundleno = 1 (0x1), region = 78 }

</bundles_post_ra>
